<compile_context>
chip_gen: v7x
topology: tpu7x:2x2x1
jax: 0.10.0
libtpu: 0.0.40
codegen_flags: <defaults>
</compile_context>

<pallas_src>
import functools

import jax
import jax.numpy as jnp
from jax.experimental import pallas as pl
from jax.experimental.pallas import tpu as pltpu

D_IN, D_H, D_OUT = 8, 128, 30
D_OUT_PAD = 128  # lane-dense padded output width


# ----------------------------- kernel -------------------------------------- #
def mlp_kernel(x_ref, w1_ref, b1_ref, w2_ref, b2_ref, w3_ref, b3_ref,
               w4_ref, b4_ref, o_ref):
    # x already arrives in the compute dtype (bf16 or f32); matmuls accumulate in
    # f32 on the MXU, bias adds in f32, ReLU in the compute dtype (cheap on
    # bf16-VALU chips, identical result either way).
    cdt = w1_ref.dtype
    h = jnp.dot(x_ref[...], w1_ref[...], preferred_element_type=jnp.float32) + b1_ref[...]
    h = jnp.maximum(h.astype(cdt), 0)
    h = jnp.dot(h, w2_ref[...], preferred_element_type=jnp.float32) + b2_ref[...]
    h = jnp.maximum(h.astype(cdt), 0)
    h = jnp.dot(h, w3_ref[...], preferred_element_type=jnp.float32) + b3_ref[...]
    h = jnp.maximum(h.astype(cdt), 0)
    out = jnp.dot(h, w4_ref[...], preferred_element_type=jnp.float32) + b4_ref[...]
    o_ref[...] = out.astype(o_ref.dtype)


# --------------------------- param preparation ------------------------------ #
def _round_up(n, m):
    return ((n + m - 1) // m) * m


def prepare_params(params, compute_dtype=jnp.bfloat16):
    """One-time device-param prep: pad the 30-wide final layer to 128 columns,
    cast weights to the compute dtype, biases stay f32 as (1, N) tiles."""
    (w1, b1), (w2, b2), (w3, b3), (w4, b4) = params
    w4p = jnp.zeros((D_H, D_OUT_PAD), w4.dtype).at[:, :D_OUT].set(w4)
    b4p = jnp.zeros((D_OUT_PAD,), b4.dtype).at[:D_OUT].set(b4)
    w1c, w2c, w3c, w4c = (w.astype(compute_dtype) for w in (w1, w2, w3, w4p))
    b1r, b2r, b3r, b4r = (b.reshape(1, -1).astype(jnp.float32)
                          for b in (b1, b2, b3, b4p))
    return (w1c, b1r, w2c, b2r, w3c, b3r, w4c, b4r)


# ----------------------------- tile selection ------------------------------- #
def _tensorcores_per_chip():
    # v7x has 2 TensorCores per chip; v5e/v6e have 1. Fall back to 1 if unknown.
    try:
        kind = jax.devices()[0].device_kind.lower()
        if "v7" in kind:
            return 2
    except Exception:
        pass
    return 1


def _choose_tm(batch, num_cores, tm_cap=2048):
    """Single big tile on single-TC chips; an even (num_cores-multiple) step count
    on multi-TC chips. VMEM is not the constraint at these sizes."""
    b8 = _round_up(max(batch, 1), 8)
    if num_cores > 1 and b8 > 8:
        tm = _round_up(pl.cdiv(b8, num_cores), 8)
    else:
        tm = b8
    return min(tm, tm_cap)


# ------------------------------- forward ------------------------------------ #
@functools.partial(jax.jit, static_argnames=("tm",))
def _forward_jit(x, dev_params, *, tm):
    """x: (B, 8) f32 -> logits (B, 30) f32. Pad/cast/slice all fuse under jit."""
    B = x.shape[0]
    cdt = dev_params[0].dtype  # compute dtype (from prepared weights)

    B_pad = _round_up(max(B, 1), tm)
    xp = x.astype(cdt)                          # pre-cast: halves the (tm, 8) DMA
    if B_pad != B:
        xp = jnp.pad(xp, ((0, B_pad - B), (0, 0)))

    grid = (B_pad // tm,)
    weight_spec = lambda shape: pl.BlockSpec(shape, lambda i: (0, 0))

    flops = 2 * B_pad * (D_IN * D_H + 2 * D_H * D_H + D_H * D_OUT_PAD)
    bytes_accessed = (
        B_pad * D_IN * xp.dtype.itemsize + B_pad * D_OUT_PAD * 4
        + sum(int(a.size) * a.dtype.itemsize for a in dev_params))

    out = pl.pallas_call(
        mlp_kernel,
        out_shape=jax.ShapeDtypeStruct((B_pad, D_OUT_PAD), jnp.float32),
        grid_spec=pltpu.PrefetchScalarGridSpec(
            num_scalar_prefetch=0,
            grid=grid,
            in_specs=[
                pl.BlockSpec((tm, D_IN), lambda i: (i, 0)),   # x tile
                weight_spec((D_IN, D_H)), weight_spec((1, D_H)),
                weight_spec((D_H, D_H)), weight_spec((1, D_H)),
                weight_spec((D_H, D_H)), weight_spec((1, D_H)),
                weight_spec((D_H, D_OUT_PAD)), weight_spec((1, D_OUT_PAD)),
            ],
            out_specs=pl.BlockSpec((tm, D_OUT_PAD), lambda i: (i, 0)),
        ),
        compiler_params=pltpu.CompilerParams(
            dimension_semantics=("parallel",)),
        cost_estimate=pl.CostEstimate(
            flops=flops, transcendentals=0, bytes_accessed=bytes_accessed),
    )(xp, *dev_params)

    return out[:B, :D_OUT]


def neural_network_forward(x, dev_params, *, tm=None):
    if tm is None:
        tm = _choose_tm(x.shape[0], _tensorcores_per_chip())
    return _forward_jit(x, dev_params, tm=tm)


# ------------------------------ reference ----------------------------------- #
def init_params(key):
    """Deterministic init mimicking PyTorch Linear default (uniform +-1/sqrt(fan_in)).
    Weights stored as (in_features, out_features) == W^T, in f32."""
    dims = [(D_IN, D_H), (D_H, D_H), (D_H, D_H), (D_H, D_OUT)]
    params = []
    for (fan_in, fan_out) in dims:
        key, kw, kb = jax.random.split(key, 3)
        bound = 1.0 / jnp.sqrt(fan_in)
        w = jax.random.uniform(kw, (fan_in, fan_out), jnp.float32, -bound, bound)
        b = jax.random.uniform(kb, (fan_out,), jnp.float32, -bound, bound)
        params.append((w, b))
    return params


def reference_forward(x, params):
    h = x
    for i, (w, b) in enumerate(params):
        h = h @ w + b
        if i < len(params) - 1:
            h = jnp.maximum(h, 0.0)
    return h


# --------------------------------- main -------------------------------------- #
if __name__ == "__main__":
    key = jax.random.PRNGKey(0)
    key, kx1, kx2 = jax.random.split(key, 3)
    params = init_params(key)

    # Default bf16-MXU path (f32 accumulation), small batch.
    dev_params_bf16 = prepare_params(params, compute_dtype=jnp.bfloat16)
    B = 32
    x = jax.random.normal(kx1, (B, D_IN), jnp.float32)
    out = jax.block_until_ready(neural_network_forward(x, dev_params_bf16))
    ref = reference_forward(x, params)
    assert out.shape == (B, D_OUT)
    assert jnp.allclose(out, ref, atol=1e-1, rtol=5e-2), \
        float(jnp.max(jnp.abs(out - ref)))

    # f32 compute path, ragged batch (not a multiple of 8): tight check.
    dev_params_f32 = prepare_params(params, compute_dtype=jnp.float32)
    B2 = 10
    x2 = jax.random.normal(kx2, (B2, D_IN), jnp.float32)
    out2 = jax.block_until_ready(neural_network_forward(x2, dev_params_f32))
    ref2 = reference_forward(x2, params)
    assert out2.shape == (B2, D_OUT)
    assert jnp.allclose(out2, ref2, atol=1e-5, rtol=1e-5), \
        float(jnp.max(jnp.abs(out2 - ref2)))

    print("KERNEL_OK")
</pallas_src>

<mosaic_0001>
module attributes {stable_mosaic.version = 11 : i64} {
  func.func @mlp_kernel(%arg0: i32, %arg1: memref<32x8xbf16, #tpu.memory_space<vmem>>, %arg2: memref<8x128xbf16, #tpu.memory_space<vmem>>, %arg3: memref<1x128xf32, #tpu.memory_space<vmem>>, %arg4: memref<128x128xbf16, #tpu.memory_space<vmem>>, %arg5: memref<1x128xf32, #tpu.memory_space<vmem>>, %arg6: memref<128x128xbf16, #tpu.memory_space<vmem>>, %arg7: memref<1x128xf32, #tpu.memory_space<vmem>>, %arg8: memref<128x128xbf16, #tpu.memory_space<vmem>>, %arg9: memref<1x128xf32, #tpu.memory_space<vmem>>, %arg10: memref<32x128xf32, #tpu.memory_space<vmem>>) attributes {dimension_semantics = [#tpu.dimension_semantics<parallel>], iteration_bounds = array<i64: 1>, scalar_prefetch = 0 : i64, scratch_operands = 0 : i64, tpu.core_type = #tpu.core_type<tc>, window_params = [{transform_indices = @transform_0, window_bounds = array<i64: 32, 8>}, {pipeline_mode = #tpu.pipeline_mode<synchronous>, transform_indices = @transform_1, window_bounds = array<i64: 8, 128>}, {pipeline_mode = #tpu.pipeline_mode<synchronous>, transform_indices = @transform_2, window_bounds = array<i64: 1, 128>}, {pipeline_mode = #tpu.pipeline_mode<synchronous>, transform_indices = @transform_3, window_bounds = array<i64: 128, 128>}, {pipeline_mode = #tpu.pipeline_mode<synchronous>, transform_indices = @transform_4, window_bounds = array<i64: 1, 128>}, {pipeline_mode = #tpu.pipeline_mode<synchronous>, transform_indices = @transform_5, window_bounds = array<i64: 128, 128>}, {pipeline_mode = #tpu.pipeline_mode<synchronous>, transform_indices = @transform_6, window_bounds = array<i64: 1, 128>}, {pipeline_mode = #tpu.pipeline_mode<synchronous>, transform_indices = @transform_7, window_bounds = array<i64: 128, 128>}, {pipeline_mode = #tpu.pipeline_mode<synchronous>, transform_indices = @transform_8, window_bounds = array<i64: 1, 128>}, {transform_indices = @transform_9, window_bounds = array<i64: 32, 128>}]} {
    %c0 = arith.constant 0 : index
    %c0_0 = arith.constant 0 : index
    %0 = vector.load %arg1[%c0, %c0_0] : memref<32x8xbf16, #tpu.memory_space<vmem>>, vector<32x8xbf16>
    %c0_1 = arith.constant 0 : index
    %c0_2 = arith.constant 0 : index
    %1 = vector.load %arg2[%c0_1, %c0_2] : memref<8x128xbf16, #tpu.memory_space<vmem>>, vector<8x128xbf16>
    %cst = arith.constant dense<0.000000e+00> : vector<32x128xf32>
    %2 = tpu.matmul %0, %1, %cst {dimension_numbers = #tpu.dot_dimension_numbers<[1], [0], [0], [1], [0, 0, 1, 1], [], []>} : vector<32x8xbf16>, vector<8x128xbf16>, vector<32x128xf32> -> vector<32x128xf32>
    %c0_3 = arith.constant 0 : index
    %c0_4 = arith.constant 0 : index
    %3 = vector.load %arg3[%c0_3, %c0_4] : memref<1x128xf32, #tpu.memory_space<vmem>>, vector<1x128xf32>
    %4 = vector.broadcast %3 : vector<1x128xf32> to vector<32x128xf32>
    %5 = arith.addf %2, %4 : vector<32x128xf32>
    %6 = arith.truncf %5 : vector<32x128xf32> to vector<32x128xbf16>
    %cst_5 = arith.constant 0.000000e+00 : bf16
    %7 = vector.broadcast %cst_5 : bf16 to vector<32x128xbf16>
    %8 = arith.maximumf %6, %7 : vector<32x128xbf16>
    %c0_6 = arith.constant 0 : index
    %c0_7 = arith.constant 0 : index
    %9 = vector.load %arg4[%c0_6, %c0_7] : memref<128x128xbf16, #tpu.memory_space<vmem>>, vector<128x128xbf16>
    %cst_8 = arith.constant dense<0.000000e+00> : vector<32x128xf32>
    %10 = tpu.matmul %8, %9, %cst_8 {dimension_numbers = #tpu.dot_dimension_numbers<[1], [0], [0], [1], [0, 0, 1, 1], [], []>} : vector<32x128xbf16>, vector<128x128xbf16>, vector<32x128xf32> -> vector<32x128xf32>
    %c0_9 = arith.constant 0 : index
    %c0_10 = arith.constant 0 : index
    %11 = vector.load %arg5[%c0_9, %c0_10] : memref<1x128xf32, #tpu.memory_space<vmem>>, vector<1x128xf32>
    %12 = vector.broadcast %11 : vector<1x128xf32> to vector<32x128xf32>
    %13 = arith.addf %10, %12 : vector<32x128xf32>
    %14 = arith.truncf %13 : vector<32x128xf32> to vector<32x128xbf16>
    %cst_11 = arith.constant 0.000000e+00 : bf16
    %15 = vector.broadcast %cst_11 : bf16 to vector<32x128xbf16>
    %16 = arith.maximumf %14, %15 : vector<32x128xbf16>
    %c0_12 = arith.constant 0 : index
    %c0_13 = arith.constant 0 : index
    %17 = vector.load %arg6[%c0_12, %c0_13] : memref<128x128xbf16, #tpu.memory_space<vmem>>, vector<128x128xbf16>
    %cst_14 = arith.constant dense<0.000000e+00> : vector<32x128xf32>
    %18 = tpu.matmul %16, %17, %cst_14 {dimension_numbers = #tpu.dot_dimension_numbers<[1], [0], [0], [1], [0, 0, 1, 1], [], []>} : vector<32x128xbf16>, vector<128x128xbf16>, vector<32x128xf32> -> vector<32x128xf32>
    %c0_15 = arith.constant 0 : index
    %c0_16 = arith.constant 0 : index
    %19 = vector.load %arg7[%c0_15, %c0_16] : memref<1x128xf32, #tpu.memory_space<vmem>>, vector<1x128xf32>
    %20 = vector.broadcast %19 : vector<1x128xf32> to vector<32x128xf32>
    %21 = arith.addf %18, %20 : vector<32x128xf32>
    %22 = arith.truncf %21 : vector<32x128xf32> to vector<32x128xbf16>
    %cst_17 = arith.constant 0.000000e+00 : bf16
    %23 = vector.broadcast %cst_17 : bf16 to vector<32x128xbf16>
    %24 = arith.maximumf %22, %23 : vector<32x128xbf16>
    %c0_18 = arith.constant 0 : index
    %c0_19 = arith.constant 0 : index
    %25 = vector.load %arg8[%c0_18, %c0_19] : memref<128x128xbf16, #tpu.memory_space<vmem>>, vector<128x128xbf16>
    %cst_20 = arith.constant dense<0.000000e+00> : vector<32x128xf32>
    %26 = tpu.matmul %24, %25, %cst_20 {dimension_numbers = #tpu.dot_dimension_numbers<[1], [0], [0], [1], [0, 0, 1, 1], [], []>} : vector<32x128xbf16>, vector<128x128xbf16>, vector<32x128xf32> -> vector<32x128xf32>
    %c0_21 = arith.constant 0 : index
    %c0_22 = arith.constant 0 : index
    %27 = vector.load %arg9[%c0_21, %c0_22] : memref<1x128xf32, #tpu.memory_space<vmem>>, vector<1x128xf32>
    %28 = vector.broadcast %27 : vector<1x128xf32> to vector<32x128xf32>
    %29 = arith.addf %26, %28 : vector<32x128xf32>
    %c0_23 = arith.constant 0 : index
    %c0_24 = arith.constant 0 : index
    %30 = vector.load %arg10[%c0_23, %c0_24] : memref<32x128xf32, #tpu.memory_space<vmem>>, vector<32x128xf32>
    tpu.vector_store %arg10[%c0_23, %c0_24], %29 {strides = array<i32>} : memref<32x128xf32, #tpu.memory_space<vmem>>, vector<32x128xf32>,
    return
  }
  func.func @transform_0(%arg0: i32) -> (i32, i32) {
    %c0_i32 = arith.constant 0 : i32
    %c0_i32_0 = arith.constant 0 : i32
    return %arg0, %c0_i32 : i32, i32
  }
  func.func @transform_1(%arg0: i32) -> (i32, i32) {
    %c0_i32 = arith.constant 0 : i32
    %c0_i32_0 = arith.constant 0 : i32
    %c0_i32_1 = arith.constant 0 : i32
    return %c0_i32, %c0_i32_0 : i32, i32
  }
  func.func @transform_2(%arg0: i32) -> (i32, i32) {
    %c0_i32 = arith.constant 0 : i32
    %c0_i32_0 = arith.constant 0 : i32
    %c0_i32_1 = arith.constant 0 : i32
    return %c0_i32, %c0_i32_0 : i32, i32
  }
  func.func @transform_3(%arg0: i32) -> (i32, i32) {
    %c0_i32 = arith.constant 0 : i32
    %c0_i32_0 = arith.constant 0 : i32
    %c0_i32_1 = arith.constant 0 : i32
    return %c0_i32, %c0_i32_0 : i32, i32
  }
  func.func @transform_4(%arg0: i32) -> (i32, i32) {
    %c0_i32 = arith.constant 0 : i32
    %c0_i32_0 = arith.constant 0 : i32
    %c0_i32_1 = arith.constant 0 : i32
    return %c0_i32, %c0_i32_0 : i32, i32
  }
  func.func @transform_5(%arg0: i32) -> (i32, i32) {
    %c0_i32 = arith.constant 0 : i32
    %c0_i32_0 = arith.constant 0 : i32
    %c0_i32_1 = arith.constant 0 : i32
    return %c0_i32, %c0_i32_0 : i32, i32
  }
  func.func @transform_6(%arg0: i32) -> (i32, i32) {
    %c0_i32 = arith.constant 0 : i32
    %c0_i32_0 = arith.constant 0 : i32
    %c0_i32_1 = arith.constant 0 : i32
    return %c0_i32, %c0_i32_0 : i32, i32
  }
  func.func @transform_7(%arg0: i32) -> (i32, i32) {
    %c0_i32 = arith.constant 0 : i32
    %c0_i32_0 = arith.constant 0 : i32
    %c0_i32_1 = arith.constant 0 : i32
    return %c0_i32, %c0_i32_0 : i32, i32
  }
  func.func @transform_8(%arg0: i32) -> (i32, i32) {
    %c0_i32 = arith.constant 0 : i32
    %c0_i32_0 = arith.constant 0 : i32
    %c0_i32_1 = arith.constant 0 : i32
    return %c0_i32, %c0_i32_0 : i32, i32
  }
  func.func @transform_9(%arg0: i32) -> (i32, i32) {
    %c0_i32 = arith.constant 0 : i32
    %c0_i32_0 = arith.constant 0 : i32
    return %arg0, %c0_i32 : i32, i32
  }
}

</mosaic_0001>

<bundles_post_ra>
// kernel: _forward_jit.1
= control target key start
LH: loop header
LB: loop body
LE: loop exit
PB: predicated region body
PF: predicated region fallthrough
CT: control target
= control target key end

     0   :  { %14 = vsyncpa [#allocation3], 0  ;;  %s956_s0 = inlined_call_operand.vmem [shape: bf16[32,8], index: 0, kind: input, shape index: {}]   ;;  %s957_s1 = inlined_call_operand.vmem [shape: bf16[8,128], index: 1, kind: input, shape index: {}]   ;;  %s958_s2 = inlined_call_operand.vmem [shape: f32[1,128], index: 2, kind: input, shape index: {}]   ;;  %s959_s3 = inlined_call_operand.hbm [shape: bf16[128,128], index: 3, kind: input, shape index: {}]   ;;  %s960_s4 = inlined_call_operand.vmem [shape: f32[1,128], index: 4, kind: input, shape index: {}]   ;;  %s961_s5 = inlined_call_operand.hbm [shape: bf16[128,128], index: 5, kind: input, shape index: {}]   ;;  %s962_s6 = inlined_call_operand.vmem [shape: f32[1,128], index: 6, kind: input, shape index: {}]   ;;  %s963_s7 = inlined_call_operand.hbm [shape: bf16[128,128], index: 7, kind: input, shape index: {}]   ;;  %s964_s8 = inlined_call_operand.vmem [shape: f32[1,128], index: 8, kind: input, shape index: {}]   ;;  %s965_s9 = inlined_call_operand.hbm [shape: f32[32,128], index: 9, kind: output, shape index: {}]  }
   0x1   :  { %15 = vsyncpa [#allocation6], 0 }
   0x2   :  { %16 = vsyncpa [#allocation4], 0  ;;  %s812_s30 = smov [#allocation5]   ;;  %s813_s11 = smov [#allocation2]  }
   0x3   :  { %s42_s10 = sshll.u32 %s812_s30, 4  ;;  %s28_s12 = sshll.u32 %s813_s11, 4  ;;  %s43_s10 = int_to_ptr.vmem [resolvable:$true] %s42_s10  ;;  %s871_s12 = int_to_ptr.vmem [resolvable:$true] %s28_s12 }
   0x4   :  { %s718_s15 = scalar_lea.hbm %s961_s5, 1024 }
   0x5   :  { %p719_p0 = scmp.ne.s32.totalorder %s961_s5, %s718_s15  ;;  %p722_p1 = scmp.lt.u32.totalorder %s718_s15, %s961_s5 }
   0x7   :  { %p724_p2 = pnand %p722_p1, %p719_p0 }
   0x9   :  { %727 = shalt.err (!%p724_p2)
}
   0xa   :  { %s728_s20 = scalar_lea.vmem %s43_s10, 1024  ;;  %p733_p4 = scmp.lt.s32.totalorder %s43_s10, %s43_s10 }
   0xb   :  { %p729_p3 = scmp.ne.s32.totalorder %s43_s10, %s728_s20  ;;  %p734_p5 = scmp.lt.s32.totalorder %s728_s20, %s728_s20 }
   0xd   :  { %p735_p6 = por %p734_p5, %p733_p4 }
   0xf   :  { %p736_p7 = pnand %p735_p6, %p729_p3 }
  0x11   :  { %739 = shalt.err (!%p736_p7)
}
  0x12   :  { %s814_s21 = smov 64   ;;  %s815_s22 = smov 4  }
  0x13   :  { %48 = dma.hbm_to_vmem [thread:$0]  %s961_s5, 1024, %s43_s10, [#allocation6], %s814_s21, %s814_s21, %s815_s22  }
  0x14   :  { %s740_s27 = scalar_lea.hbm %s959_s3, 1024 }
  0x15   :  { %p741_p8 = scmp.ne.s32.totalorder %s959_s3, %s740_s27  ;;  %p744_p9 = scmp.lt.u32.totalorder %s740_s27, %s959_s3 }
  0x17   :  { %p746_p10 = pnand %p744_p9, %p741_p8 }
  0x19   :  { %749 = shalt.err (!%p746_p10)
}
  0x1a   :  { %s750_s13 = scalar_lea.vmem %s871_s12, 1024  ;;  %p755_p12 = scmp.lt.s32.totalorder %s871_s12, %s871_s12 }
  0x1b   :  { %p751_p11 = scmp.ne.s32.totalorder %s871_s12, %s750_s13  ;;  %p756_p13 = scmp.lt.s32.totalorder %s750_s13, %s750_s13 }
  0x1d   :  { %p757_p0 = por %p756_p13, %p755_p12 }
  0x1f   :  { %p758_p1 = pnand %p757_p0, %p751_p11 }
  0x21   :  { %761 = shalt.err (!%p758_p1)
}
  0x22   :  { %34 = dma.hbm_to_vmem [thread:$0]  %s959_s3, 1024, %s871_s12, [#allocation3], %s814_s21, %s814_s21, %s815_s22  }
  0x23   :  { %s816_s14 = smov [#allocation7]   ;;  %s762_s18 = scalar_lea.hbm %s963_s7, 1024 }
  0x24   :  { %s56_s15 = sshll.u32 %s816_s14, 4  ;;  %p763_p2 = scmp.ne.s32.totalorder %s963_s7, %s762_s18  ;;  %s57_s15 = int_to_ptr.vmem [resolvable:$true] %s56_s15 }
  0x25   :  { %p766_p3 = scmp.lt.u32.totalorder %s762_s18, %s963_s7 }
  0x27   :  { %p768_p4 = pnand %p766_p3, %p763_p2 }
  0x29   :  { %771 = shalt.err (!%p768_p4)
}
  0x2a   :  { %s772_s25 = scalar_lea.vmem %s57_s15, 1024  ;;  %p777_p6 = scmp.lt.s32.totalorder %s57_s15, %s57_s15 }
  0x2b   :  { %p773_p5 = scmp.ne.s32.totalorder %s57_s15, %s772_s25  ;;  %p778_p7 = scmp.lt.s32.totalorder %s772_s25, %s772_s25 }
  0x2d   :  { %p779_p8 = por %p778_p7, %p777_p6 }
  0x2f   :  { %p780_p9 = pnand %p779_p8, %p773_p5 }
  0x31   :  { %783 = shalt.err (!%p780_p9)
}
  0x32   :  { %62 = dma.hbm_to_vmem [thread:$0]  %s963_s7, 1024, %s57_s15, [#allocation6], %s814_s21, %s814_s21, %s815_s22  }
  0x33   :  { %806 = dma.done.wait [#allocation3], 1024  }
  0x34   :  { %807 = vsyncadd [#allocation3], 4294966272 }
  0x35   :  { %808 = dma.done.wait [#allocation6], 2048  }
  0x36   :  { %809 = vsyncadd [#allocation6], 4294965248  ;;  %vm104_vm0 = vcmask 1043456   ;;  %vm97_vm1 = vcmask 64512   ;;  %v79_v0 = vld [vmem:[%s957_s1] sm:$0xf] }
  0x37   :  { %682 = vmatprep.subr.msk.bf16.mxu0 %vm104_vm0, %v79_v0  ;;  %v106_v1 = vsel %vm104_vm0, %v79_v0, 0  ;;  %v692_v2 = vld [vmem:[%s956_s0] sm:$0xff]   ;;  %v693_v3 = vld [vmem:[%s956_s0 + $0x8] sm:$0xff]   ;;  %v696_v6 = vld [vmem:[#allocation2 + $0x10] sm:$0xff]   ;;  %v817_v29 = vmov 0   ;;  %s818_s5 = smov [#allocation8]  }
  0x38   :  { %617 = vmatpush3.bf16.msra.mxu0 %v106_v1  ;;  %618 = vmatprep.mubr.msk.bf16.mxu0 %vm97_vm1, %v692_v2  ;;  %v694_v4 = vld [vmem:[#allocation2] sm:$0xff]   ;;  %v695_v5 = vld [vmem:[#allocation2 + $0x8] sm:$0xff]   ;;  %v697_v7 = vld [vmem:[#allocation2 + $0x18] sm:$0xff]  }
  0x39   :  { %622 = vmatprep.subr.bf16.mxu1 %v694_v4  ;;  %v698_v8 = vld [vmem:[#allocation2 + $0x20] sm:$0xff]   ;;  %v699_v9 = vld [vmem:[#allocation2 + $0x28] sm:$0xff]   ;;  %v700_v10 = vld [vmem:[#allocation2 + $0x30] sm:$0xff]  }
  0x3a   :  { %623 = vmatpush3.bf16.msra.mxu1 %v694_v4  ;;  %v701_v11 = vld [vmem:[#allocation2 + $0x38] sm:$0xff]   ;;  %v702_v12 = vld [vmem:[#allocation5] sm:$0xff]   ;;  %v703_v13 = vld [vmem:[#allocation5 + $0x8] sm:$0xff]  }
  0x3b   :  { %619 = vmatmul.mubr.msk.bf16.vlgmr.msra.gmra.mrb[0].mxu0 %vm97_vm1, %v693_v3  ;;  %624 = vmatprep.subr.bf16.mxu1 %v695_v5  ;;  %v704_v14 = vld [vmem:[#allocation5 + $0x10] sm:$0xff]   ;;  %v705_v15 = vld [vmem:[#allocation5 + $0x18] sm:$0xff]   ;;  %v706_v16 = vld [vmem:[#allocation5 + $0x20] sm:$0xff]  }
  0x3c   :  { %642 = vmatprep.subr.bf16.mxu0 %v702_v12  ;;  %v707_v17 = vld [vmem:[#allocation5 + $0x28] sm:$0xff]   ;;  %v551_v19 = vld [vmem:[%s958_s2] ss:$0 sm:$0xff]  ;;  %v708_v32 = vld [vmem:[#allocation5 + $0x30] sm:$0xff]  }
  0x3d   :  { %643 = vmatpush3.bf16.msra.mxu0 %v702_v12  ;;  %v709_v33 = vld [vmem:[#allocation5 + $0x38] sm:$0xff]   ;;  %v710_v34 = vld [vmem:[#allocation7] sm:$0xff]   ;;  %v711_v35 = vld [vmem:[#allocation7 + $0x8] sm:$0xff]  }
  0x3e   :  { %625 = vmatpush3.bf16.msra.mxu1 %v695_v5  ;;  %644 = vmatprep.subr.bf16.mxu0 %v703_v13  ;;  %v712_v36 = vld [vmem:[#allocation7 + $0x10] sm:$0xff]   ;;  %v713_v37 = vld [vmem:[#allocation7 + $0x18] sm:$0xff]   ;;  %v714_v38 = vld [vmem:[#allocation7 + $0x20] sm:$0xff]  }
  0x3f   :  { %626 = vmatprep.subr.bf16.mxu1 %v696_v6  ;;  %v715_v39 = vld [vmem:[#allocation7 + $0x28] sm:$0xff]   ;;  %v556_v41 = vld [vmem:[%s960_s4] ss:$0 sm:$0xff]  ;;  %v716_v53 = vld [vmem:[#allocation7 + $0x30] sm:$0xff]  }
  0x40   :  { %v717_v54 = vld [vmem:[#allocation7 + $0x38] sm:$0xff]   ;;  %v565_v56 = vld [vmem:[%s962_s6] ss:$0 sm:$0xff]  ;;  %s538_s6 = sshll.u32 %s818_s5, 4  ;;  %s539_s6 = int_to_ptr.vmem [resolvable:$true] %s538_s6 }
  0x41   :  { %645 = vmatpush3.bf16.msra.mxu0 %v703_v13  ;;  %v574_v4 = vld [vmem:[%s964_s8] ss:$0 sm:$0xff]  ;;  %s784_s10 = scalar_lea.vmem %s539_s6, 512  ;;  %p789_p11 = scmp.lt.s32.totalorder %s539_s6, %s539_s6 }
  0x42   :  { %627 = vmatpush3.bf16.msra.mxu1 %v696_v6  ;;  %646 = vmatprep.subr.bf16.mxu0 %v704_v14  ;;  %p785_p10 = scmp.ne.s32.totalorder %s539_s6, %s784_s10  ;;  %p790_p12 = scmp.lt.s32.totalorder %s784_s10, %s784_s10 }
  0x43   :  { %628 = vmatprep.subr.bf16.mxu1 %v697_v7 }
  0x44   :  { %p791_p13 = por %p790_p12, %p789_p11 }
  0x45   :  { %647 = vmatpush3.bf16.msra.mxu0 %v704_v14 }
  0x46   :  { %629 = vmatpush3.bf16.msra.mxu1 %v697_v7  ;;  %648 = vmatprep.subr.bf16.mxu0 %v705_v15  ;;  %p792_p0 = pnand %p791_p13, %p785_p10 }
  0x47   :  { %630 = vmatprep.subr.bf16.mxu1 %v698_v8 }
  0x49   :  { %649 = vmatpush3.bf16.msra.mxu0 %v705_v15 }
  0x4a   :  { %631 = vmatpush3.bf16.msra.mxu1 %v698_v8  ;;  %650 = vmatprep.subr.bf16.mxu0 %v706_v16 }
  0x4b   :  { %632 = vmatprep.subr.bf16.mxu1 %v699_v9 }
  0x4d   :  { %651 = vmatpush3.bf16.msra.mxu0 %v706_v16 }
  0x4e   :  { %633 = vmatpush3.bf16.msra.mxu1 %v699_v9  ;;  %652 = vmatprep.subr.bf16.mxu0 %v707_v17 }
  0x4f   :  { %634 = vmatprep.subr.bf16.mxu1 %v700_v10 }
  0x51   :  { %653 = vmatpush3.bf16.msra.mxu0 %v707_v17 }
  0x52   :  { %635 = vmatpush3.bf16.msra.mxu1 %v700_v10  ;;  %654 = vmatprep.subr.bf16.mxu0 %v708_v32 }
  0x53   :  { %636 = vmatprep.subr.bf16.mxu1 %v701_v11 }
  0x55   :  { %655 = vmatpush3.bf16.msra.mxu0 %v708_v32 }
  0x56   :  { %637 = vmatpush3.bf16.msra.mxu1 %v701_v11  ;;  %656 = vmatprep.subr.bf16.mxu0 %v709_v33 }
  0x57   :  { %662 = vmatprep.subr.bf16.mxu1 %v710_v34 }
  0x59   :  { %657 = vmatpush3.bf16.msra.mxu0 %v709_v33 }
 0x10e   :  { %v620_v18 = vpop.f32.mrb[0].mxu0 }
 0x10f   :  { %v142_v20 = vpop.f32.mrb[1].mxu0  ;;  %v151_v22 = vadd.f32 %v620_v18, %v551_v19 }
 0x110   :  { %v621_v21 = vpop.f32.mrb[2].mxu0  ;;  %v143_v25 = vadd.f32 %v551_v19, %v142_v20 }
 0x111   :  { %v154_v23 = vadd.f32 %v621_v21, %v551_v19  ;;  %v145_v24 = vpop.f32.mrb[3].mxu0 }
 0x112   :  { %v146_v26 = vadd.f32 %v551_v19, %v145_v24 }
 0x113   :  { %v158_v27 = vpack.c.bf16 %v154_v23, %v151_v22 }
 0x114   :  { %v157_v28 = vpack.c.bf16 %v146_v26, %v143_v25 }
 0x115   :  { %v160_v31 = vmax.bf16 %v817_v29, %v158_v27 }
 0x116   :  { %v159_v30 = vmax.bf16 %v817_v29, %v157_v28 }
 0x118   :  { %638 = vmatprep.mubr.bf16.mxu1 %v159_v30 }
 0x119   :  { %639 = vmatmul.mubr.bf16.vlgmr.msra.gmra.mrb[0].mxu1 %v160_v31 }
 0x11a   :  { %663 = vmatpush3.bf16.msra.mxu1 %v710_v34 }
 0x11b   :  { %664 = vmatprep.subr.bf16.mxu1 %v711_v35 }
 0x11e   :  { %665 = vmatpush3.bf16.msra.mxu1 %v711_v35 }
 0x11f   :  { %666 = vmatprep.subr.bf16.mxu1 %v712_v36 }
 0x122   :  { %667 = vmatpush3.bf16.msra.mxu1 %v712_v36 }
 0x123   :  { %668 = vmatprep.subr.bf16.mxu1 %v713_v37 }
 0x126   :  { %669 = vmatpush3.bf16.msra.mxu1 %v713_v37 }
 0x127   :  { %670 = vmatprep.subr.bf16.mxu1 %v714_v38 }
 0x12a   :  { %671 = vmatpush3.bf16.msra.mxu1 %v714_v38 }
 0x12b   :  { %672 = vmatprep.subr.bf16.mxu1 %v715_v39 }
 0x12e   :  { %673 = vmatpush3.bf16.msra.mxu1 %v715_v39 }
 0x12f   :  { %674 = vmatprep.subr.bf16.mxu1 %v716_v53 }
 0x132   :  { %675 = vmatpush3.bf16.msra.mxu1 %v716_v53 }
 0x133   :  { %676 = vmatprep.subr.bf16.mxu1 %v717_v54 }
 0x136   :  { %677 = vmatpush3.bf16.msra.mxu1 %v717_v54 }
 0x1ec   :  { %v640_v40 = vpop.f32.mrb[0].mxu1 }
 0x1ed   :  { %v266_v42 = vpop.f32.mrb[1].mxu1  ;;  %v275_v44 = vadd.f32 %v640_v40, %v556_v41 }
 0x1ee   :  { %v641_v43 = vpop.f32.mrb[2].mxu1  ;;  %v267_v47 = vadd.f32 %v556_v41, %v266_v42 }
 0x1ef   :  { %v278_v45 = vadd.f32 %v641_v43, %v556_v41  ;;  %v269_v46 = vpop.f32.mrb[3].mxu1 }
 0x1f0   :  { %v270_v48 = vadd.f32 %v556_v41, %v269_v46 }
 0x1f1   :  { %v282_v49 = vpack.c.bf16 %v278_v45, %v275_v44 }
 0x1f2   :  { %v281_v50 = vpack.c.bf16 %v270_v48, %v267_v47 }
 0x1f3   :  { %v284_v52 = vmax.bf16 %v817_v29, %v282_v49 }
 0x1f4   :  { %v283_v51 = vmax.bf16 %v817_v29, %v281_v50 }
 0x1f6   :  { %658 = vmatprep.mubr.bf16.mxu0 %v283_v51 }
 0x1f7   :  { %659 = vmatmul.mubr.bf16.vlgmr.msra.gmra.mrb[4].mxu0 %v284_v52 }
 0x2ca   :  { %v660_v55 = vpop.f32.mrb[4].mxu0 }
 0x2cb   :  { %v390_v57 = vpop.f32.mrb[5].mxu0  ;;  %v399_v59 = vadd.f32 %v660_v55, %v565_v56 }
 0x2cc   :  { %v661_v58 = vpop.f32.mrb[6].mxu0  ;;  %v391_v62 = vadd.f32 %v565_v56, %v390_v57 }
 0x2cd   :  { %v402_v60 = vadd.f32 %v661_v58, %v565_v56  ;;  %v393_v61 = vpop.f32.mrb[7].mxu0 }
 0x2ce   :  { %v394_v63 = vadd.f32 %v565_v56, %v393_v61 }
 0x2cf   :  { %v406_v0 = vpack.c.bf16 %v402_v60, %v399_v59 }
 0x2d0   :  { %v405_v1 = vpack.c.bf16 %v394_v63, %v391_v62 }
 0x2d1   :  { %v408_v3 = vmax.bf16 %v817_v29, %v406_v0 }
 0x2d2   :  { %v407_v2 = vmax.bf16 %v817_v29, %v405_v1 }
 0x2d4   :  { %678 = vmatprep.mubr.bf16.mxu1 %v407_v2 }
 0x2d5   :  { %679 = vmatmul.mubr.bf16.vlgmr.msra.gmra.mrb[4].mxu1 %v408_v3 }
 0x3a8   :  { %v680_v5 = vpop.f32.mrb[4].mxu1 }
 0x3a9   :  { %v523_v6 = vadd.f32 %v680_v5, %v574_v4  ;;  %v514_v7 = vpop.f32.mrb[5].mxu1 }
 0x3aa   :  { %v515_v8 = vadd.f32 %v574_v4, %v514_v7  ;;  %v681_v9 = vpop.f32.mrb[6].mxu1 }
 0x3ab   :  { %531 = vst [vmem:[#allocation8 + $0x10] sm:$0xff] %v523_v6  ;;  %v526_v10 = vadd.f32 %v681_v9, %v574_v4  ;;  %v517_v11 = vpop.f32.mrb[7].mxu1 }
 0x3ac   :  { %529 = vst [vmem:[#allocation8] sm:$0xff] %v515_v8  ;;  %v518_v12 = vadd.f32 %v574_v4, %v517_v11 }
 0x3ad   :  { %532 = vst [vmem:[#allocation8 + $0x18] sm:$0xff] %v526_v10 }
 0x3ae   :  { %530 = vst [vmem:[#allocation8 + $0x8] sm:$0xff] %v518_v12 }
 0x3af   :  { %795 = shalt.err (!%p792_p0)
}
 0x3b0   :  { %s796_s15 = scalar_lea.hbm %s965_s9, 512 }
 0x3b1   :  { %p797_p1 = scmp.ne.s32.totalorder %s965_s9, %s796_s15  ;;  %p800_p2 = scmp.lt.u32.totalorder %s796_s15, %s965_s9 }
 0x3b3   :  { %p802_p3 = pnand %p800_p2, %p797_p1 }
 0x3b5   :  { %805 = shalt.err (!%p802_p3)
}
 0x3b6   :  { %s819_s20 = smov 128   ;;  %s820_s23 = smov 8  }
 0x3b7   :  { %544 = dma.vmem_to_hbm [thread:$0]  %s539_s6, 512, %s965_s9, [#allocation4], %s819_s20, %s819_s20, %s820_s23  }
 0x3b8   :  { %810 = dma.done.wait [#allocation4], 512  }
 0x3b9   :  { %811 = vsyncadd [#allocation4], 4294966784 }
 0x3ba   :  { %548 = vsyncpa [#allocation3], 1 }
 0x3bb   :  { %549 = vsyncpa [#allocation6], 1 }
 0x3bc   :  { %550 = vsyncpa [#allocation4], 1 }

</bundles_post_ra>
